<compile_context>
chip_gen: v5e
topology: v5e:2x2
jax: 0.10.0
libtpu: 0.0.40
codegen_flags: <defaults>
</compile_context>

<pallas_src>
import jax
import jax.numpy as jnp
from jax.experimental import pallas as pl
from jax.experimental.pallas import tpu as pltpu

EMB_DIM = 32        # emb_hidden_dim
HID_DIM = 16        # hidden
K_CHEB = 2          # Chebyshev order K -> K+1 = 3 taps (T0, T1, T2)
Q = 0.25            # magnetic potential q
BY_DISC = 4         # num_birthyear_disc (rm_feature = -999 != 0)
NUM_SYMP = 15       # rm_feature = -999 not in range(2, 17)
NUM_OPTIONS = 3     # replace_missing_value == 'replace'
IN_CHANNELS = 17


def magnet_kernel(oh_ref, pr_ref, pi_ref, ew1_ref, v_ref, c_ref, out_ref):
    f32, bf16 = jnp.float32, jnp.bfloat16
    hd = HID_DIM
    pr = pr_ref[...]                 # [N,N] bf16  Re(L~^T)
    pi = pi_ref[...]                 # [N,N] bf16  Im(L~^T)

    def prop(x):                     # f32 [N,F] -> (Pr@x, Pi@x), f32 accumulation
        xb = x.astype(bf16)
        return (jnp.dot(pr, xb, preferred_element_type=f32),
                jnp.dot(pi, xb, preferred_element_type=f32))

    # embeddings + averaging + layer-1 tap weights + bias, all folded into one
    # [N,52] @ [52,48] matmul:  y[:, k*hd:(k+1)*hd] = x0 @ W1_k  (k=0 block carries b1)
    y = jnp.dot(oh_ref[...], ew1_ref[...], preferred_element_type=f32)
    y0, y2 = y[:, :hd], y[:, 2 * hd:]

    # TODO(synk): training-mode F.dropout not implemented (drop_out=False -> identity;
    # activation=False -> no complex_relu); eval-mode forward only.

    # ---- MagNetConv #1: exact complex Chebyshev, x_real = x_imag = x0 ----
    g_r, g_i = prop(y[:, hd:])                        # Pr/Pi @ [y1 | y2]
    t1_r = g_r[:, :hd] - g_i[:, :hd]                  # Re(T1 z1),  z_k = y_k*(1+i)
    t1_i = g_r[:, :hd] + g_i[:, :hd]                  # Im(T1 z1)
    q_r = g_r[:, hd:] - g_i[:, hd:]                   # Re(L~ z2)
    q_i = g_r[:, hd:] + g_i[:, hd:]                   # Im(L~ z2)
    s_r, s_i = prop(jnp.concatenate([q_r, q_i], axis=1))
    t2_r = 2.0 * (s_r[:, :hd] - s_i[:, hd:]) - y2     # Re(T2 z2) = Re(2 L~(L~ z2) - z2)
    t2_i = 2.0 * (s_r[:, hd:] + s_i[:, :hd]) - y2
    real1 = y0 + t1_r + t2_r                          # bias b1 baked into y0
    imag1 = y0 + t1_i + t2_i

    # ---- MagNetConv #2 + Conv1d(1x1) + Linear folded into V [hd,6], scalar c ----
    # V cols 0..2 = W2_k @ head_real, cols 3..5 = W2_k @ head_imag.
    cr = jnp.dot(real1, v_ref[...], preferred_element_type=f32)   # [N,6]
    ci = jnp.dot(imag1, v_ref[...], preferred_element_type=f32)
    e_r, e_i = prop(jnp.concatenate([cr, ci], axis=1))
    u1_r = e_r[:, :6] - e_i[:, 6:]                    # Re(T1 C)
    u1_i = e_r[:, 6:] + e_i[:, :6]                    # Im(T1 C)
    w_r, w_i = prop(jnp.concatenate([u1_r, u1_i], axis=1))
    u2_r = 2.0 * (w_r[:, :6] - w_i[:, 6:]) - cr       # Re(T2 C)
    u2_i = 2.0 * (w_r[:, 6:] + w_i[:, :6]) - ci       # Im(T2 C)

    out_ref[...] = (cr[:, 0:1] + u1_r[:, 1:2] + u2_r[:, 2:3] +
                    ci[:, 3:4] + u1_i[:, 4:5] + u2_i[:, 5:6] + c_ref[...])


def magnetic_propagation_matrices(edge_index, num_nodes, q=Q, edge_weight=None):
    """Dense Re/Im of the scaled magnetic Laplacian applied by MagNetConv
    ('sym', lambda_max=2):  L~ = 2L/lambda_max - I = -(H (.) e^{i*Theta}), with
    H = D^-1/2 A_s D^-1/2, A_s=(A+A^T)/2 (self loops removed), Theta=2*pi*q*(A-A^T).
    Returned as L~^T (= conj(L~)) so that `P @ x` matches PyG source->target
    message aggregation."""
    src, dst = edge_index
    w = (jnp.ones(src.shape, jnp.float32) if edge_weight is None
         else edge_weight.astype(jnp.float32))
    a = jnp.zeros((num_nodes, num_nodes), jnp.float32).at[src, dst].add(w)
    a = a * (1.0 - jnp.eye(num_nodes, dtype=jnp.float32))       # remove self loops
    a_sym = 0.5 * (a + a.T)
    theta = (2.0 * jnp.pi * q) * (a - a.T)
    deg = a_sym.sum(axis=1)
    dinv = jnp.where(deg > 0.0, 1.0 / jnp.sqrt(jnp.where(deg > 0.0, deg, 1.0)), 0.0)
    h = a_sym * dinv[:, None] * dinv[None, :]
    p_real = -(h * jnp.cos(theta))          # symmetric part
    p_imag = h * jnp.sin(theta)             # antisymmetric part (transposed sign)
    return p_real, p_imag


def magnet_forward(params, x, edge_index, edge_weight=None):
    """Eval-mode MagNet forward.  All parameter folding happens here (wrapper side,
    eval-only: recompute if the weights change)."""
    n = x.shape[0]
    hd = HID_DIM

    # --- index extraction, identical to the PyTorch forward ---
    b_idx = jnp.argmax(x[:, :BY_DISC] == 1.0, axis=1)           # (x[:,:4]==1).nonzero()[1]
    g_idx = x[:, BY_DISC].astype(jnp.int32)                     # x[:,4].int()
    s_idx = x[:, -NUM_SYMP:].astype(jnp.int32)                  # x[:,-15+i].int()
    oh_all = jnp.concatenate([
        jax.nn.one_hot(b_idx, BY_DISC, dtype=jnp.float32),
        jax.nn.one_hot(g_idx, 2, dtype=jnp.float32),
        jax.nn.one_hot(s_idx, NUM_OPTIONS, dtype=jnp.float32).reshape(n, NUM_SYMP * NUM_OPTIONS),
    ], axis=1)                                                  # [N, 51]
    oh_aug = jnp.concatenate([oh_all, jnp.ones((n, 1), jnp.float32)], axis=1)   # [N, 52]

    # --- fold embeddings (+/15, /3 means) with layer-1 taps and bias -> [52, 3h] ---
    emb = jnp.concatenate([params['e_birth'], params['e_gender'],
                           params['e_symp'] / NUM_SYMP], axis=0) / 3.0          # [51, 32]
    ew1 = jnp.concatenate([emb @ params['w1'][k] for k in range(K_CHEB + 1)], axis=1)
    bias_row = jnp.concatenate([params['b1'][None, :],
                                jnp.zeros((1, K_CHEB * hd), jnp.float32)], axis=1)
    ew1_aug = jnp.concatenate([ew1, bias_row], axis=0)                          # [52, 48]

    # --- fold Conv1d(2h,2h,1) + Linear(2h,1) + layer-2 taps/bias -> V [h,6], c ---
    w_head = params['w_conv'].T @ params['w_lin'].T                             # [2h, 1]
    b_head = params['b_conv'] @ params['w_lin'].T + params['b_lin']             # [1]
    wh_r, wh_i = w_head[:hd], w_head[hd:]
    v = jnp.concatenate([params['w2'][k] @ wh_r for k in range(K_CHEB + 1)] +
                        [params['w2'][k] @ wh_i for k in range(K_CHEB + 1)], axis=1)  # [h, 6]
    c = (params['b2'] @ (wh_r + wh_i) + b_head).reshape(1, 1)

    # --- dense magnetic Laplacian (the only O(N^2) operands) in bf16 ---
    p_real, p_imag = magnetic_propagation_matrices(edge_index, n, Q, edge_weight)
    args = (oh_aug, p_real.astype(jnp.bfloat16), p_imag.astype(jnp.bfloat16),
            ew1_aug, v, c)

    vmem = pl.BlockSpec(memory_space=pltpu.MemorySpace.VMEM)
    operand_bytes = sum(int(a.size) * a.dtype.itemsize for a in args)
    out = pl.pallas_call(
        magnet_kernel,
        out_shape=jax.ShapeDtypeStruct((n, 1), jnp.float32),
        in_specs=[vmem] * len(args),
        out_specs=vmem,
        compiler_params=pltpu.CompilerParams(
            # whole-graph-in-VMEM assumption; beyond this a (row, col)-gridded adj
            # tiling is required (v7x physical VMEM is only 64 MiB).
            vmem_limit_bytes=int(min(max(2 * operand_bytes + (2 << 20), 16 << 20),
                                     48 << 20))),
    )(*args)
    return out[:, 0]                                            # matches x.squeeze()


if __name__ == "__main__":
    key = jax.random.PRNGKey(0)
    N = 16
    (k_birth, k_gender, k_symp, k_eb, k_eg, k_es, k_w1, k_b1, k_w2, k_b2,
     k_cw, k_cb, k_lw, k_lb) = jax.random.split(key, 14)

    # node features x: [N, 17] in the layout the PyTorch forward expects
    birth_idx = jax.random.randint(k_birth, (N,), 0, BY_DISC)
    gender_val = jax.random.randint(k_gender, (N,), 0, 2)
    tail = jax.random.randint(k_symp, (N, IN_CHANNELS - BY_DISC - 1), 0, NUM_OPTIONS)
    x = jnp.concatenate([
        jax.nn.one_hot(birth_idx, BY_DISC, dtype=jnp.float32),   # cols 0..3
        gender_val[:, None].astype(jnp.float32),                 # col 4
        tail.astype(jnp.float32),                                # cols 5..16
    ], axis=1)

    # directed graph: reciprocated ring edges (feed Re(L~)) + one-way skip edges
    # (feed Im(L~) since Theta = 2*pi*q = pi/2 for q = 0.25)
    idx = jnp.arange(N)
    edge_index = jnp.concatenate([
        jnp.stack([idx, (idx + 1) % N]),
        jnp.stack([(idx + 1) % N, idx]),
        jnp.stack([idx, (idx + 3) % N]),
    ], axis=1)                                                   # [2, 3N]

    params = {
        'e_birth': jax.random.normal(k_eb, (BY_DISC, EMB_DIM), jnp.float32),
        'e_gender': jax.random.normal(k_eg, (2, EMB_DIM), jnp.float32),
        # 15 x Embedding(3, 32) stacked row-wise so one-hot matmul == per-table lookups
        'e_symp': jax.random.normal(k_es, (NUM_SYMP * NUM_OPTIONS, EMB_DIM), jnp.float32),
        'w1': 0.1 * jax.random.normal(k_w1, (K_CHEB + 1, EMB_DIM, HID_DIM), jnp.float32),
        'b1': 0.1 * jax.random.normal(k_b1, (HID_DIM,), jnp.float32),
        'w2': 0.1 * jax.random.normal(k_w2, (K_CHEB + 1, HID_DIM, HID_DIM), jnp.float32),
        'b2': 0.1 * jax.random.normal(k_b2, (HID_DIM,), jnp.float32),
        'w_conv': 0.1 * jax.random.normal(k_cw, (2 * HID_DIM, 2 * HID_DIM), jnp.float32),
        'b_conv': 0.1 * jax.random.normal(k_cb, (2 * HID_DIM,), jnp.float32),
        'w_lin': 0.1 * jax.random.normal(k_lw, (1, 2 * HID_DIM), jnp.float32),
        'b_lin': 0.1 * jax.random.normal(k_lb, (1,), jnp.float32),
    }

    out = magnet_forward(params, x, edge_index)
    out = jax.block_until_ready(out)
    assert out.shape == (N,) and out.dtype == jnp.float32
    assert bool(jnp.all(jnp.isfinite(out)))
    print("KERNEL_OK")
</pallas_src>

<mosaic_0001>
module attributes {stable_mosaic.version = 11 : i64} {
  func.func @magnet_kernel(%arg0: memref<16x52xf32, #tpu.memory_space<vmem>>, %arg1: memref<16x16xbf16, #tpu.memory_space<vmem>>, %arg2: memref<16x16xbf16, #tpu.memory_space<vmem>>, %arg3: memref<52x48xf32, #tpu.memory_space<vmem>>, %arg4: memref<16x6xf32, #tpu.memory_space<vmem>>, %arg5: memref<1x1xf32, #tpu.memory_space<vmem>>, %arg6: memref<16x1xf32, #tpu.memory_space<vmem>>) attributes {dimension_semantics = [], scalar_prefetch = 0 : i64, scratch_operands = 0 : i64, tpu.core_type = #tpu.core_type<tc>} {
    %c0 = arith.constant 0 : index
    %c0_0 = arith.constant 0 : index
    %0 = vector.load %arg1[%c0, %c0_0] : memref<16x16xbf16, #tpu.memory_space<vmem>>, vector<16x16xbf16>
    %c0_1 = arith.constant 0 : index
    %c0_2 = arith.constant 0 : index
    %1 = vector.load %arg2[%c0_1, %c0_2] : memref<16x16xbf16, #tpu.memory_space<vmem>>, vector<16x16xbf16>
    %c0_3 = arith.constant 0 : index
    %c0_4 = arith.constant 0 : index
    %2 = vector.load %arg0[%c0_3, %c0_4] : memref<16x52xf32, #tpu.memory_space<vmem>>, vector<16x52xf32>
    %c0_5 = arith.constant 0 : index
    %c0_6 = arith.constant 0 : index
    %3 = vector.load %arg3[%c0_5, %c0_6] : memref<52x48xf32, #tpu.memory_space<vmem>>, vector<52x48xf32>
    %cst = arith.constant dense<0.000000e+00> : vector<16x48xf32>
    %4 = tpu.matmul %2, %3, %cst {dimension_numbers = #tpu.dot_dimension_numbers<[1], [0], [0], [1], [0, 0, 1, 1], [], []>} : vector<16x52xf32>, vector<52x48xf32>, vector<16x48xf32> -> vector<16x48xf32>
    %5 = vector.extract_strided_slice %4 {offsets = [0, 0], sizes = [16, 16], strides = [1, 1]} : vector<16x48xf32> to vector<16x16xf32>
    %6 = vector.extract_strided_slice %4 {offsets = [0, 32], sizes = [16, 16], strides = [1, 1]} : vector<16x48xf32> to vector<16x16xf32>
    %7 = vector.extract_strided_slice %4 {offsets = [0, 16], sizes = [16, 32], strides = [1, 1]} : vector<16x48xf32> to vector<16x32xf32>
    %8 = arith.truncf %7 : vector<16x32xf32> to vector<16x32xbf16>
    %cst_7 = arith.constant dense<0.000000e+00> : vector<16x32xf32>
    %9 = tpu.matmul %0, %8, %cst_7 {dimension_numbers = #tpu.dot_dimension_numbers<[1], [0], [0], [1], [0, 0, 1, 1], [], []>} : vector<16x16xbf16>, vector<16x32xbf16>, vector<16x32xf32> -> vector<16x32xf32>
    %cst_8 = arith.constant dense<0.000000e+00> : vector<16x32xf32>
    %10 = tpu.matmul %1, %8, %cst_8 {dimension_numbers = #tpu.dot_dimension_numbers<[1], [0], [0], [1], [0, 0, 1, 1], [], []>} : vector<16x16xbf16>, vector<16x32xbf16>, vector<16x32xf32> -> vector<16x32xf32>
    %11 = vector.extract_strided_slice %9 {offsets = [0, 0], sizes = [16, 16], strides = [1, 1]} : vector<16x32xf32> to vector<16x16xf32>
    %12 = vector.extract_strided_slice %10 {offsets = [0, 0], sizes = [16, 16], strides = [1, 1]} : vector<16x32xf32> to vector<16x16xf32>
    %13 = arith.subf %11, %12 : vector<16x16xf32>
    %14 = vector.extract_strided_slice %9 {offsets = [0, 0], sizes = [16, 16], strides = [1, 1]} : vector<16x32xf32> to vector<16x16xf32>
    %15 = vector.extract_strided_slice %10 {offsets = [0, 0], sizes = [16, 16], strides = [1, 1]} : vector<16x32xf32> to vector<16x16xf32>
    %16 = arith.addf %14, %15 : vector<16x16xf32>
    %17 = vector.extract_strided_slice %9 {offsets = [0, 16], sizes = [16, 16], strides = [1, 1]} : vector<16x32xf32> to vector<16x16xf32>
    %18 = vector.extract_strided_slice %10 {offsets = [0, 16], sizes = [16, 16], strides = [1, 1]} : vector<16x32xf32> to vector<16x16xf32>
    %19 = arith.subf %17, %18 : vector<16x16xf32>
    %20 = vector.extract_strided_slice %9 {offsets = [0, 16], sizes = [16, 16], strides = [1, 1]} : vector<16x32xf32> to vector<16x16xf32>
    %21 = vector.extract_strided_slice %10 {offsets = [0, 16], sizes = [16, 16], strides = [1, 1]} : vector<16x32xf32> to vector<16x16xf32>
    %22 = arith.addf %20, %21 : vector<16x16xf32>
    %23 = tpu.concatenate %19, %22 in 1 : vector<16x16xf32>, vector<16x16xf32> -> vector<16x32xf32>
    %24 = arith.truncf %23 : vector<16x32xf32> to vector<16x32xbf16>
    %cst_9 = arith.constant dense<0.000000e+00> : vector<16x32xf32>
    %25 = tpu.matmul %0, %24, %cst_9 {dimension_numbers = #tpu.dot_dimension_numbers<[1], [0], [0], [1], [0, 0, 1, 1], [], []>} : vector<16x16xbf16>, vector<16x32xbf16>, vector<16x32xf32> -> vector<16x32xf32>
    %cst_10 = arith.constant dense<0.000000e+00> : vector<16x32xf32>
    %26 = tpu.matmul %1, %24, %cst_10 {dimension_numbers = #tpu.dot_dimension_numbers<[1], [0], [0], [1], [0, 0, 1, 1], [], []>} : vector<16x16xbf16>, vector<16x32xbf16>, vector<16x32xf32> -> vector<16x32xf32>
    %27 = vector.extract_strided_slice %25 {offsets = [0, 0], sizes = [16, 16], strides = [1, 1]} : vector<16x32xf32> to vector<16x16xf32>
    %28 = vector.extract_strided_slice %26 {offsets = [0, 16], sizes = [16, 16], strides = [1, 1]} : vector<16x32xf32> to vector<16x16xf32>
    %29 = arith.subf %27, %28 : vector<16x16xf32>
    %cst_11 = arith.constant 2.000000e+00 : f32
    %30 = vector.broadcast %cst_11 : f32 to vector<16x16xf32>
    %31 = arith.mulf %30, %29 : vector<16x16xf32>
    %32 = arith.subf %31, %6 : vector<16x16xf32>
    %33 = vector.extract_strided_slice %25 {offsets = [0, 16], sizes = [16, 16], strides = [1, 1]} : vector<16x32xf32> to vector<16x16xf32>
    %34 = vector.extract_strided_slice %26 {offsets = [0, 0], sizes = [16, 16], strides = [1, 1]} : vector<16x32xf32> to vector<16x16xf32>
    %35 = arith.addf %33, %34 : vector<16x16xf32>
    %cst_12 = arith.constant 2.000000e+00 : f32
    %36 = vector.broadcast %cst_12 : f32 to vector<16x16xf32>
    %37 = arith.mulf %36, %35 : vector<16x16xf32>
    %38 = arith.subf %37, %6 : vector<16x16xf32>
    %39 = arith.addf %5, %13 : vector<16x16xf32>
    %40 = arith.addf %39, %32 : vector<16x16xf32>
    %41 = arith.addf %5, %16 : vector<16x16xf32>
    %42 = arith.addf %41, %38 : vector<16x16xf32>
    %c0_13 = arith.constant 0 : index
    %c0_14 = arith.constant 0 : index
    %43 = vector.load %arg4[%c0_13, %c0_14] : memref<16x6xf32, #tpu.memory_space<vmem>>, vector<16x6xf32>
    %cst_15 = arith.constant dense<0.000000e+00> : vector<16x6xf32>
    %44 = tpu.matmul %40, %43, %cst_15 {dimension_numbers = #tpu.dot_dimension_numbers<[1], [0], [0], [1], [0, 0, 1, 1], [], []>} : vector<16x16xf32>, vector<16x6xf32>, vector<16x6xf32> -> vector<16x6xf32>
    %c0_16 = arith.constant 0 : index
    %c0_17 = arith.constant 0 : index
    %45 = vector.load %arg4[%c0_16, %c0_17] : memref<16x6xf32, #tpu.memory_space<vmem>>, vector<16x6xf32>
    %cst_18 = arith.constant dense<0.000000e+00> : vector<16x6xf32>
    %46 = tpu.matmul %42, %45, %cst_18 {dimension_numbers = #tpu.dot_dimension_numbers<[1], [0], [0], [1], [0, 0, 1, 1], [], []>} : vector<16x16xf32>, vector<16x6xf32>, vector<16x6xf32> -> vector<16x6xf32>
    %47 = tpu.concatenate %44, %46 in 1 : vector<16x6xf32>, vector<16x6xf32> -> vector<16x12xf32>
    %48 = arith.truncf %47 : vector<16x12xf32> to vector<16x12xbf16>
    %cst_19 = arith.constant dense<0.000000e+00> : vector<16x12xf32>
    %49 = tpu.matmul %0, %48, %cst_19 {dimension_numbers = #tpu.dot_dimension_numbers<[1], [0], [0], [1], [0, 0, 1, 1], [], []>} : vector<16x16xbf16>, vector<16x12xbf16>, vector<16x12xf32> -> vector<16x12xf32>
    %cst_20 = arith.constant dense<0.000000e+00> : vector<16x12xf32>
    %50 = tpu.matmul %1, %48, %cst_20 {dimension_numbers = #tpu.dot_dimension_numbers<[1], [0], [0], [1], [0, 0, 1, 1], [], []>} : vector<16x16xbf16>, vector<16x12xbf16>, vector<16x12xf32> -> vector<16x12xf32>
    %51 = vector.extract_strided_slice %49 {offsets = [0, 0], sizes = [16, 6], strides = [1, 1]} : vector<16x12xf32> to vector<16x6xf32>
    %52 = vector.extract_strided_slice %50 {offsets = [0, 6], sizes = [16, 6], strides = [1, 1]} : vector<16x12xf32> to vector<16x6xf32>
    %53 = arith.subf %51, %52 : vector<16x6xf32>
    %54 = vector.extract_strided_slice %49 {offsets = [0, 6], sizes = [16, 6], strides = [1, 1]} : vector<16x12xf32> to vector<16x6xf32>
    %55 = vector.extract_strided_slice %50 {offsets = [0, 0], sizes = [16, 6], strides = [1, 1]} : vector<16x12xf32> to vector<16x6xf32>
    %56 = arith.addf %54, %55 : vector<16x6xf32>
    %57 = tpu.concatenate %53, %56 in 1 : vector<16x6xf32>, vector<16x6xf32> -> vector<16x12xf32>
    %58 = arith.truncf %57 : vector<16x12xf32> to vector<16x12xbf16>
    %cst_21 = arith.constant dense<0.000000e+00> : vector<16x12xf32>
    %59 = tpu.matmul %0, %58, %cst_21 {dimension_numbers = #tpu.dot_dimension_numbers<[1], [0], [0], [1], [0, 0, 1, 1], [], []>} : vector<16x16xbf16>, vector<16x12xbf16>, vector<16x12xf32> -> vector<16x12xf32>
    %cst_22 = arith.constant dense<0.000000e+00> : vector<16x12xf32>
    %60 = tpu.matmul %1, %58, %cst_22 {dimension_numbers = #tpu.dot_dimension_numbers<[1], [0], [0], [1], [0, 0, 1, 1], [], []>} : vector<16x16xbf16>, vector<16x12xbf16>, vector<16x12xf32> -> vector<16x12xf32>
    %61 = vector.extract_strided_slice %59 {offsets = [0, 0], sizes = [16, 6], strides = [1, 1]} : vector<16x12xf32> to vector<16x6xf32>
    %62 = vector.extract_strided_slice %60 {offsets = [0, 6], sizes = [16, 6], strides = [1, 1]} : vector<16x12xf32> to vector<16x6xf32>
    %63 = arith.subf %61, %62 : vector<16x6xf32>
    %cst_23 = arith.constant 2.000000e+00 : f32
    %64 = vector.broadcast %cst_23 : f32 to vector<16x6xf32>
    %65 = arith.mulf %64, %63 : vector<16x6xf32>
    %66 = arith.subf %65, %44 : vector<16x6xf32>
    %67 = vector.extract_strided_slice %59 {offsets = [0, 6], sizes = [16, 6], strides = [1, 1]} : vector<16x12xf32> to vector<16x6xf32>
    %68 = vector.extract_strided_slice %60 {offsets = [0, 0], sizes = [16, 6], strides = [1, 1]} : vector<16x12xf32> to vector<16x6xf32>
    %69 = arith.addf %67, %68 : vector<16x6xf32>
    %cst_24 = arith.constant 2.000000e+00 : f32
    %70 = vector.broadcast %cst_24 : f32 to vector<16x6xf32>
    %71 = arith.mulf %70, %69 : vector<16x6xf32>
    %72 = arith.subf %71, %46 : vector<16x6xf32>
    %73 = vector.extract_strided_slice %44 {offsets = [0, 0], sizes = [16, 1], strides = [1, 1]} : vector<16x6xf32> to vector<16x1xf32>
    %74 = vector.extract_strided_slice %53 {offsets = [0, 1], sizes = [16, 1], strides = [1, 1]} : vector<16x6xf32> to vector<16x1xf32>
    %75 = arith.addf %73, %74 : vector<16x1xf32>
    %76 = vector.extract_strided_slice %66 {offsets = [0, 2], sizes = [16, 1], strides = [1, 1]} : vector<16x6xf32> to vector<16x1xf32>
    %77 = arith.addf %75, %76 : vector<16x1xf32>
    %78 = vector.extract_strided_slice %46 {offsets = [0, 3], sizes = [16, 1], strides = [1, 1]} : vector<16x6xf32> to vector<16x1xf32>
    %79 = arith.addf %77, %78 : vector<16x1xf32>
    %80 = vector.extract_strided_slice %56 {offsets = [0, 4], sizes = [16, 1], strides = [1, 1]} : vector<16x6xf32> to vector<16x1xf32>
    %81 = arith.addf %79, %80 : vector<16x1xf32>
    %82 = vector.extract_strided_slice %72 {offsets = [0, 5], sizes = [16, 1], strides = [1, 1]} : vector<16x6xf32> to vector<16x1xf32>
    %83 = arith.addf %81, %82 : vector<16x1xf32>
    %c0_25 = arith.constant 0 : index
    %c0_26 = arith.constant 0 : index
    %84 = vector.load %arg5[%c0_25, %c0_26] : memref<1x1xf32, #tpu.memory_space<vmem>>, vector<1x1xf32>
    %85 = vector.broadcast %84 : vector<1x1xf32> to vector<16x1xf32>
    %86 = arith.addf %83, %85 : vector<16x1xf32>
    %c0_27 = arith.constant 0 : index
    %c0_28 = arith.constant 0 : index
    %87 = vector.load %arg6[%c0_27, %c0_28] : memref<16x1xf32, #tpu.memory_space<vmem>>, vector<16x1xf32>
    tpu.vector_store %arg6[%c0_27, %c0_28], %86 {strides = array<i32>} : memref<16x1xf32, #tpu.memory_space<vmem>>, vector<16x1xf32>,
    return
  }
}

</mosaic_0001>

<bundles_post_ra>
// kernel: tpu_custom_call.1
= control target key start
LH: loop header
LB: loop body
LE: loop exit
PB: predicated region body
PF: predicated region fallthrough
CT: control target
= control target key end

     0   :  { %vm46_vm0 = vcmask 1043456   ;;  %vm39_vm1 = vcmask 424960   ;;  %vm83_vm2 = vcmask 130048   ;;  %vm290_vm3 = vcmask 48128   ;;  %s503_s22 = smov 122   ;;  %s504_s23 = smov 127   ;;  %s672_s3 = inlined_call_operand.vmem [shape: f32[52,48], index: 3, kind: input, shape index: {}]   ;;  %s673_s0 = inlined_call_operand.vmem [shape: f32[16,52], index: 0, kind: input, shape index: {}]   ;;  %s674_s1 = inlined_call_operand.vmem [shape: bf16[16,16], index: 1, kind: input, shape index: {}]   ;;  %s675_s2 = inlined_call_operand.vmem [shape: bf16[16,16], index: 2, kind: input, shape index: {}]   ;;  %s676_s4 = inlined_call_operand.vmem [shape: f32[16,6], index: 4, kind: input, shape index: {}]   ;;  %s677_s5 = inlined_call_operand.<no memory space> [shape: f32[1,1], index: 5, kind: input, shape index: {}]   ;;  %s678_s6 = inlined_call_operand.vmem [shape: f32[16,1], index: 6, kind: output, shape index: {}]  }
   0x1   :  { %v38_v0 = vld [vmem:[%s672_s3 + $0x30] sm:$0xf]  ;;  %v37_v1 = vld [vmem:[%s672_s3 + $0x28] sm:$0xff]  ;;  %v36_v2 = vld [vmem:[%s672_s3 + $0x20] sm:$0xff]  ;;  %s505_s24 = smov 125   ;;  %s506_s25 = smov 118  }
   0x2   :  { %458 = vmatpush.msk.msra.mxu0 %vm46_vm0, %v38_v0  ;;  %v35_v3 = vld [vmem:[%s672_s3 + $0x18] sm:$0xff]  ;;  %v34_v4 = vld [vmem:[%s672_s3 + $0x10] sm:$0xff]  ;;  %v33_v5 = vld [vmem:[%s672_s3 + $0x8] sm:$0xff]  ;;  %s507_s26 = smov 126   ;;  %s508_s27 = smov 117   ;;  %vm451_vm4 = vcmask 7168  }
   0x3   :  { %v32_v6 = vld [vmem:[%s672_s3] sm:$0xff]  ;;  %v31_v8 = vld [vmem:[%s673_s0 + $0x8] sm:$0xff]  ;;  %s499_s3 = smov 112  }
   0x4   :  { %60 = vmatpush.msra.mxu0 %v37_v1  ;;  %v30_v7 = vld [vmem:[%s673_s0] sm:$0xff]  ;;  %s500_s0 = smov 16   ;;  %v223_v44 = vld [vmem:[%s676_s4 + $0x8] sm:$0xff] }
   0x5   :  { %v581_v13 = vld [vmem:[%s674_s1] sm:$0xff]  ;;  %s501_s1 = smov 96  }
   0x6   :  { %61 = vmatpush.msra.mxu0 %v36_v2  ;;  %v586_v14 = vld [vmem:[%s675_s2] sm:$0xff] }
   0x7   :  { %v222_v45 = vld [vmem:[%s676_s4] sm:$0xff]  ;;  %s502_s4 = smov 6  }
   0x8   :  { %62 = vmatpush.msra.mxu0 %v35_v3 }
   0xa   :  { %63 = vmatpush.msra.mxu0 %v34_v4 }
   0xc   :  { %64 = vmatpush.msra.mxu0 %v33_v5 }
   0xe   :  { %65 = vmatpush.msra.mxu0 %v32_v6 }
   0xf   :  { %459 = vmatmul.msk.f32.vlgmr.msra.gmra.mxu0 %vm39_vm1, %v30_v7 }
  0x17   :  { %460 = vmatmul.msk.f32.gmra.mxu0 %vm39_vm1, %v31_v8 }
  0x8c   :  { %v571_v9 = vpop.f32.mrf.mxu0 }
  0x94   :  { %v573_v10 = vpop.f32.mrf.mxu0 }
  0x95   :  { %v73_v11 = vpack.c.bf16 %v573_v10, %v571_v9 }
  0x97   :  { %80 = vrot.lane.b32.xlu0 %v73_v11, %s499_s3 }
 0x109   :  { %v81_v12 = vpop.permute.xlu0 %80 }
 0x10a   :  { %94 = vmatpush.bf16.msra.mxu1 %v81_v12  ;;  %116 = vmatpush.bf16.msra.mxu2 %v81_v12 }
 0x10d   :  { %465 = vmatmul.msk.bf16.vlgmr.msra.gmra.mxu1 %vm83_vm2, %v581_v13  ;;  %470 = vmatmul.msk.bf16.vlgmr.msra.gmra.mxu2 %vm83_vm2, %v586_v14 }
 0x10e   :  { %244 = vmatpush.msrb.mxu2 %v223_v44 }
 0x110   :  { %245 = vmatpush.msrb.mxu2 %v222_v45 }
 0x18a   :  { %v96_v15 = vpop.f32.mrf.mxu1 }
 0x190   :  { %v118_v16 = vpop.f32.mrf.mxu2 }
 0x191   :  { %v125_v17 = vadd.f32 %v118_v16, %v96_v15  ;;  %v123_v20 = vsub.f32 %v96_v15, %v118_v16 }
 0x192   :  { %v98_v18 = vpop.f32.mrf.mxu1 }
 0x193   :  { %v210_v47 = vadd.f32 %v125_v17, %v571_v9  ;;  %v206_v57 = vadd.f32 %v123_v20, %v571_v9 }
 0x198   :  { %v120_v19 = vpop.f32.mrf.mxu2 }
 0x199   :  { %v592_v21 = vsub.f32 %v98_v18, %v120_v19  ;;  %v126_v24 = vadd.f32 %v120_v19, %v98_v18 }
 0x19b   :  { %v493_v22 = vpack.i.bf16 %v592_v21, %v123_v20  ;;  %v211_v54 = vadd.f32 %v126_v24, %v573_v10  ;;  %v207_v0 = vadd.f32 %v592_v21, %v573_v10 }
 0x19d   :  { %494 = vrot.lane.b32.xlu0 %v493_v22, %s499_s3 }
 0x20f   :  { %v495_v23 = vpop.permute.xlu0 %494 }
 0x210   :  { %v497_v25 = vunpack.i.h.bf16 %v495_v23  ;;  %v496_v26 = vunpack.i.l.bf16 %v495_v23 }
 0x212   :  { %v135_v27 = vsel %vm83_vm2, %v496_v26, %v125_v17  ;;  %v136_v28 = vsel %vm83_vm2, %v497_v25, %v126_v24 }
 0x213   :  { %v137_v29 = vpack.c.bf16 %v136_v28, %v135_v27 }
 0x215   :  { %145 = vmatpush.bf16.msra.mxu3 %v137_v29  ;;  %159 = vmatpush.bf16.msrb.mxu1 %v137_v29 }
 0x218   :  { %472 = vmatmul.msk.bf16.vlgmr.msrb.gmra.mxu1 %vm83_vm2, %v586_v14  ;;  %471 = vmatmul.msk.bf16.vlgmr.msra.gmra.mxu3 %vm83_vm2, %v581_v13 }
 0x219   :  { %273 = vmatpush.msrb.mxu3 %v223_v44 }
 0x21b   :  { %274 = vmatpush.msrb.mxu3 %v222_v45 }
 0x295   :  { %v161_v30 = vpop.f32.mrf.mxu1 }
 0x296   :  { %188 = vrot.lane.b32.xlu1 %v161_v30, %s500_s0 }
 0x29b   :  { %v147_v32 = vpop.f32.mrf.mxu3 }
 0x29d   :  { %v163_v31 = vpop.f32.mrf.mxu1 }
 0x29e   :  { %198 = vrot.lane.b32.xlu1 %v571_v9, %s499_s3  ;;  %190 = vrot.lane.b32.xlu2 %v163_v31, %s500_s0 }
 0x2a3   :  { %v149_v34 = vpop.f32.mrf.mxu3 }
 0x2a6   :  { %200 = vrot.lane.b32.xlu2 %v573_v10, %s499_s3 }
 0x2ae   :  { %168 = vrot.lane.b32.xlu2 %v161_v30, %s499_s3 }
 0x2b6   :  { %182 = vrot.lane.b32.xlu2 %v573_v10, %s501_s1 }
 0x2f8   :  { %v191_v33 = vpop.permute.xlu2 %190 }
 0x2f9   :  { %v195_v35 = vadd.f32 %v191_v33, %v149_v34 }
 0x2fb   :  { %v197_v36 = vmul.f32 2.0, %v195_v35 }
 0x300   :  { %v201_v37 = vpop.permute.xlu2 %200 }
 0x301   :  { %v205_v38 = vsub.f32 %v197_v36, %v201_v37 }
 0x303   :  { %216 = vrot.lane.b32.xlu1 %v205_v38, %s499_s3 }
 0x308   :  { %v189_v39 = vpop.permute.xlu1 %188  ;;  %v169_v48 = vpop.permute.xlu2 %168 }
 0x309   :  { %v194_v40 = vadd.f32 %v189_v39, %v147_v32  ;;  %v174_v51 = vsub.f32 %v147_v32, %v169_v48 }
 0x30b   :  { %170 = vrot.lane.b32.xlu1 %v163_v31, %s499_s3  ;;  %v196_v41 = vmul.f32 2.0, %v194_v40  ;;  %v176_v53 = vmul.f32 2.0, %v174_v51 }
 0x310   :  { %v199_v42 = vpop.permute.xlu1 %198  ;;  %v183_v62 = vpop.permute.xlu2 %182 }
 0x311   :  { %v204_v43 = vsub.f32 %v196_v41, %v199_v42 }
 0x313   :  { %214 = vrot.lane.b32.xlu0 %v204_v43, %s499_s3 }
 0x31b   :  { %180 = vrot.lane.b32.xlu0 %v571_v9, %s501_s1 }
 0x375   :  { %v217_v46 = vpop.permute.xlu1 %216 }
 0x376   :  { %v221_v58 = vadd.f32 %v217_v46, %v211_v54  ;;  %v11_v46 = vstv %s677_s5 }
 0x377   :  { %12 = vst [vmem:[#allocation2] sm:$0x1] %v11_v46 }
 0x37d   :  { %v171_v52 = vpop.permute.xlu1 %170 }
 0x37e   :  { %v175_v55 = vsub.f32 %v149_v34, %v171_v52 }
 0x380   :  { %v177_v60 = vmul.f32 2.0, %v175_v55 }
 0x382   :  { %v187_v63 = vsub.f32 %v177_v60, %v183_v62 }
 0x384   :  { %v209_v1 = vadd.f32 %v207_v0, %v187_v63 }
 0x385   :  { %v215_v49 = vpop.permute.xlu0 %214 }
 0x386   :  { %v220_v50 = vadd.f32 %v215_v49, %v210_v47 }
 0x388   :  { %475 = vmatmul.msk.f32.vlgmr.msrb.gmra.mxu3 %vm83_vm2, %v220_v50 }
 0x38d   :  { %v181_v56 = vpop.permute.xlu0 %180 }
 0x38e   :  { %v186_v59 = vsub.f32 %v176_v53, %v181_v56 }
 0x390   :  { %v208_v61 = vadd.f32 %v206_v57, %v186_v59  ;;  %476 = vmatmul.msk.f32.gmra.mxu3 %vm83_vm2, %v221_v58  ;;  %v498_v57 = vld [vmem:[#allocation2] ss:$0 sm:$0xff] }
 0x392   :  { %473 = vmatmul.msk.f32.vlgmr.msrb.gmra.mxu2 %vm83_vm2, %v208_v61 }
 0x39a   :  { %474 = vmatmul.msk.f32.gmra.mxu2 %vm83_vm2, %v209_v1 }
 0x40b   :  { %v276_v2 = vpop.f32.mrf.mxu3 }
 0x40c   :  { %284 = vrot.lane.b32.xlu0 %v276_v2, %s502_s4 }
 0x413   :  { %v279_v3 = vpop.f32.mrf.mxu3 }
 0x414   :  { %286 = vrot.lane.b32.xlu1 %v279_v3, %s502_s4 }
 0x415   :  { %v629_v4 = vpop.f32.mrf.mxu2 }
 0x41d   :  { %v633_v6 = vpop.f32.mrf.mxu2 }
 0x47e   :  { %v631_v5 = vpop.permute.xlu0 %284 }
 0x47f   :  { %v291_v8 = vsel %vm290_vm3, %v629_v4, %v631_v5 }
 0x486   :  { %v635_v7 = vpop.permute.xlu1 %286 }
 0x487   :  { %v292_v9 = vsel %vm290_vm3, %v633_v6, %v635_v7 }
 0x488   :  { %v293_v10 = vpack.c.bf16 %v292_v9, %v291_v8 }
 0x48a   :  { %301 = vmatpush.bf16.msrb.mxu0 %v293_v10  ;;  %315 = vmatpush.bf16.msra.mxu1 %v293_v10 }
 0x48d   :  { %478 = vmatmul.msk.bf16.vlgmr.msra.gmra.mxu1 %vm83_vm2, %v586_v14  ;;  %477 = vmatmul.msk.bf16.vlgmr.msrb.gmra.mxu0 %vm83_vm2, %v581_v13 }
 0x50a   :  { %v317_v11 = vpop.f32.mrf.mxu1  ;;  %v303_v16 = vpop.f32.mrf.mxu0 }
 0x50b   :  { %332 = vrot.lane.b32.xlu1 %v317_v11, %s502_s4  ;;  %324 = vrot.lane.b32.xlu2 %v317_v11, %s503_s22 }
 0x512   :  { %v319_v12 = vpop.f32.mrf.mxu1  ;;  %v305_v19 = vpop.f32.mrf.mxu0 }
 0x513   :  { %334 = vrot.lane.b32.xlu2 %v319_v12, %s502_s4  ;;  %326 = vrot.lane.b32.xlu0 %v319_v12, %s503_s22 }
 0x565   :  { %v325_v15 = vpop.permute.xlu2 %324 }
 0x566   :  { %v330_v22 = vsub.f32 %v303_v16, %v325_v15 }
 0x56d   :  { %v335_v18 = vpop.permute.xlu2 %334 }
 0x56e   :  { %v339_v23 = vadd.f32 %v335_v18, %v305_v19 }
 0x57d   :  { %v333_v17 = vpop.permute.xlu1 %332 }
 0x57e   :  { %v338_v20 = vadd.f32 %v333_v17, %v303_v16 }
 0x580   :  { %v340_v25 = vsel %vm290_vm3, %v330_v22, %v338_v20 }
 0x585   :  { %v327_v21 = vpop.permute.xlu0 %326 }
 0x586   :  { %v331_v24 = vsub.f32 %v305_v19, %v327_v21 }
 0x588   :  { %v341_v26 = vsel %vm290_vm3, %v331_v24, %v339_v23 }
 0x589   :  { %v342_v27 = vpack.c.bf16 %v341_v26, %v340_v25 }
 0x58b   :  { %350 = vmatpush.bf16.msra.mxu2 %v342_v27  ;;  %364 = vmatpush.bf16.msra.mxu3 %v342_v27 }
 0x58e   :  { %480 = vmatmul.msk.bf16.vlgmr.msra.gmra.mxu3 %vm83_vm2, %v586_v14  ;;  %479 = vmatmul.msk.bf16.vlgmr.msra.gmra.mxu2 %vm83_vm2, %v581_v13 }
 0x611   :  { %v366_v28 = vpop.f32.mrf.mxu3  ;;  %v352_v14 = vpop.f32.mrf.mxu2 }
 0x612   :  { %385 = vrot.lane.b32.xlu2 %v366_v28, %s502_s4  ;;  %373 = vrot.lane.b32.xlu0 %v366_v28, %s503_s22 }
 0x619   :  { %v368_v29 = vpop.f32.mrf.mxu3  ;;  %v354_v37 = vpop.f32.mrf.mxu2 }
 0x61a   :  { %401 = vrot.lane.b32.xlu2 %v331_v24, %s504_s23  ;;  %387 = vrot.lane.b32.xlu0 %v368_v29, %s502_s4 }
 0x61b   :  { %375 = vrot.lane.b32.xlu1 %v368_v29, %s503_s22 }
 0x622   :  { %417 = vrot.lane.b32.xlu2 %v276_v2, %s505_s24  ;;  %419 = vrot.lane.b32.xlu0 %v279_v3, %s505_s24 }
 0x623   :  { %399 = vrot.lane.b32.xlu1 %v330_v22, %s504_s23 }
 0x62a   :  { %429 = vrot.lane.b32.xlu2 %v339_v23, %s506_s25 }
 0x62b   :  { %427 = vrot.lane.b32.xlu1 %v338_v20, %s506_s25 }
 0x66c   :  { %v386_v31 = vpop.permute.xlu2 %385 }
 0x66d   :  { %v391_v33 = vadd.f32 %v386_v31, %v352_v14 }
 0x66f   :  { %v393_v35 = vmul.f32 2.0, %v391_v33 }
 0x671   :  { %v395_v41 = vsub.f32 %v393_v35, %v631_v5 }
 0x674   :  { %v402_v48 = vpop.permute.xlu2 %401 }
 0x675   :  { %v406_v58 = vadd.f32 %v402_v48, %v633_v6 }
 0x67c   :  { %v418_v54 = vpop.permute.xlu2 %417 }
 0x684   :  { %v374_v30 = vpop.permute.xlu0 %373  ;;  %v430_v1 = vpop.permute.xlu2 %429 }
 0x685   :  { %v379_v13 = vsub.f32 %v352_v14, %v374_v30 }
 0x687   :  { %v381_v32 = vmul.f32 2.0, %v379_v13 }
 0x689   :  { %v383_v34 = vsub.f32 %v381_v32, %v629_v4 }
 0x68b   :  { %409 = vrot.lane.b32.xlu0 %v383_v34, %s507_s26 }
 0x68c   :  { %v388_v39 = vpop.permute.xlu0 %387 }
 0x68d   :  { %v376_v36 = vpop.permute.xlu1 %375  ;;  %v392_v43 = vadd.f32 %v388_v39, %v354_v37 }
 0x68e   :  { %v380_v38 = vsub.f32 %v354_v37, %v376_v36 }
 0x68f   :  { %v394_v44 = vmul.f32 2.0, %v392_v43 }
 0x690   :  { %v382_v40 = vmul.f32 2.0, %v380_v38 }
 0x691   :  { %v396_v45 = vsub.f32 %v394_v44, %v635_v7 }
 0x692   :  { %v384_v42 = vsub.f32 %v382_v40, %v633_v6 }
 0x693   :  { %437 = vrot.lane.b32.xlu0 %v395_v41, %s508_s27 }
 0x694   :  { %411 = vrot.lane.b32.xlu1 %v384_v42, %s507_s26  ;;  %v420_v49 = vpop.permute.xlu0 %419 }
 0x695   :  { %v400_v47 = vpop.permute.xlu1 %399 }
 0x696   :  { %v405_v50 = vadd.f32 %v400_v47, %v629_v4 }
 0x69c   :  { %439 = vrot.lane.b32.xlu1 %v396_v45, %s508_s27 }
 0x69d   :  { %v428_v52 = vpop.permute.xlu1 %427 }
 0x6fd   :  { %v410_v51 = vpop.permute.xlu0 %409 }
 0x6fe   :  { %v415_v53 = vadd.f32 %v410_v51, %v405_v50 }
 0x700   :  { %v423_v55 = vadd.f32 %v418_v54, %v415_v53 }
 0x702   :  { %v433_v56 = vadd.f32 %v428_v52, %v423_v55 }
 0x705   :  { %v438_v59 = vpop.permute.xlu0 %437 }
 0x706   :  { %v443_v60 = vadd.f32 %v438_v59, %v433_v56  ;;  %v412_v61 = vpop.permute.xlu1 %411 }
 0x707   :  { %v416_v62 = vadd.f32 %v412_v61, %v406_v58 }
 0x708   :  { %v449_v63 = vadd.f32 %v498_v57, %v443_v60 }
 0x709   :  { %v424_v0 = vadd.f32 %v420_v49, %v416_v62 }
 0x70a   :  { %452 = vst.msk [vmem:[%s678_s6] sm:$0xff] %vm451_vm4, %v449_v63 }
 0x70b   :  { %v434_v2 = vadd.f32 %v430_v1, %v424_v0 }
 0x70e   :  { %v440_v3 = vpop.permute.xlu1 %439 }
 0x70f   :  { %v444_v4 = vadd.f32 %v440_v3, %v434_v2 }
 0x711   :  { %v450_v5 = vadd.f32 %v498_v57, %v444_v4 }
 0x713   :  { %453 = vst.msk [vmem:[%s678_s6 + $0x8] sm:$0xff] %vm451_vm4, %v450_v5 }

</bundles_post_ra>
